<compile_context>
chip_gen: v6e
topology: v6e:2x2x1
jax: 0.10.0
libtpu: 0.0.40
codegen_flags: <defaults>
</compile_context>

<pallas_src>
import functools

import jax
import jax.numpy as jnp
from jax import lax
from jax.experimental import pallas as pl
from jax.experimental.pallas import tpu as pltpu

CLASSES = 9
EPSILON = 1e-7
NUM_CORES = 2  # v7x has 2 TensorCores; harmless (runs serially) on v5e/v6e.


def _f1_partials_kernel(y_pred_ref, y_true_ref, out_ref, tp_acc, sp_acc, cnt_acc,
                        *, n, tile_n, tiles_per_core, classes, approx_recip):
    core = pl.program_id(0)
    t = pl.program_id(1)

    @pl.when(t == 0)
    def _init():
        tp_acc[...] = jnp.zeros_like(tp_acc)
        sp_acc[...] = jnp.zeros_like(sp_acc)
        cnt_acc[...] = jnp.zeros_like(cnt_acc)

    # Global column (sample) index of every lane in this tile.  The last block
    # of the batch may be ragged (undefined tail bytes) and remainder blocks of
    # the core split are entirely out of range (index_map clamps them onto the
    # last real block) -- both are neutralized by this mask.
    col = (core * tiles_per_core + t) * tile_n + lax.broadcasted_iota(
        jnp.int32, (1, tile_n), 1)
    valid = col < n                                              # (1, T) bool

    x = y_pred_ref[...].astype(jnp.float32)                      # (C, T)
    x = jnp.where(valid, x, 0.0)                                 # scrub undefined tail
    labels = jnp.where(valid, y_true_ref[...], -1)               # (1, T) int32

    # softmax over the class (sublane) axis; columns are independent
    m = jnp.max(x, axis=0, keepdims=True)                        # (1, T)
    e = jnp.exp(x - m)                                           # (C, T)
    denom = jnp.sum(e, axis=0, keepdims=True)                    # (1, T)
    p = e * pl.reciprocal(denom, approx=approx_recip)            # (C, T)

    class_ids = lax.broadcasted_iota(jnp.int32, (classes, tile_n), 0)
    onehot = class_ids == labels                 # (C, T) bool; all-False on invalid cols

    # per-class partial sums over this batch tile (lane reductions)
    tp_acc[...] += jnp.sum(jnp.where(onehot, p, 0.0), axis=1, keepdims=True)
    sp_acc[...] += jnp.sum(jnp.where(valid, p, 0.0), axis=1, keepdims=True)
    cnt_acc[...] += jnp.sum(jnp.where(onehot, 1.0, 0.0), axis=1, keepdims=True)

    @pl.when(t == pl.num_programs(1) - 1)
    def _write():
        out_ref[0] = tp_acc[...]      # tp
        out_ref[1] = sp_acc[...]      # sum_p = tp + fp
        out_ref[2] = cnt_acc[...]     # cnt   = tp + fn


def f1_loss(y_pred, y_true, classes=CLASSES, epsilon=EPSILON, tile_n=32768,
            approx_recip=True):
    assert y_pred.ndim == 2
    assert y_true.ndim == 1
    n, c = y_pred.shape
    assert c == classes
    assert tile_n % 128 == 0

    # clamp tile so tiny batches don't trace a huge block
    tile_n = max(128, min(tile_n, ((n + 127) // 128) * 128))

    num_tiles = (n + tile_n - 1) // tile_n            # ragged tail masked in-kernel
    tiles_per_core = (num_tiles + NUM_CORES - 1) // NUM_CORES

    # lane-dense layout: classes on sublanes, batch on lanes; keep caller dtype
    # (bf16 input halves DMA traffic; kernel upcasts to f32).
    # TODO(synk): emit logits in (C, N) layout upstream to drop this HBM copy.
    y_pred_t = jnp.transpose(y_pred)                  # (C, N)
    labels = y_true.astype(jnp.int32).reshape(1, n)   # (1, N)

    def block_idx(core, t):
        # Remainder blocks of the core split would index past the array; clamp
        # them onto the last real block (their contribution is zeroed by the
        # in-kernel validity mask, which uses the *unclamped* column base).
        return (0, jnp.minimum(core * tiles_per_core + t, num_tiles - 1))

    kernel = functools.partial(
        _f1_partials_kernel, n=n, tile_n=tile_n, tiles_per_core=tiles_per_core,
        classes=classes, approx_recip=approx_recip)

    partials = pl.pallas_call(
        kernel,
        out_shape=jax.ShapeDtypeStruct((NUM_CORES * 3, classes, 1), jnp.float32),
        grid_spec=pltpu.PrefetchScalarGridSpec(
            num_scalar_prefetch=0,
            grid=(NUM_CORES, tiles_per_core),
            in_specs=[
                pl.BlockSpec((classes, tile_n), block_idx),   # y_pred (C, N)
                pl.BlockSpec((1, tile_n), block_idx),         # labels (1, N)
            ],
            out_specs=pl.BlockSpec((3, classes, 1), lambda core, t: (core, 0, 0)),
            scratch_shapes=[
                pltpu.VMEM((classes, 1), jnp.float32),   # tp
                pltpu.VMEM((classes, 1), jnp.float32),   # sum_p
                pltpu.VMEM((classes, 1), jnp.float32),   # class counts
            ],
        ),
        compiler_params=pltpu.CompilerParams(
            dimension_semantics=("parallel", "arbitrary"),
            vmem_limit_bytes=40 * 1024 * 1024,   # headroom at tile_n=32768 on v5e
        ),
    )(y_pred_t, labels)

    # tiny 9-class epilogue in plain JAX (sum per-core partials, then F1)
    sums = jnp.sum(partials.reshape(NUM_CORES, 3, classes), axis=0)   # (3, C)
    tp, sum_p, cnt = sums[0], sums[1], sums[2]
    precision = tp / (sum_p + epsilon)
    recall = tp / (cnt + epsilon)
    f1 = 2.0 * (precision * recall) / (precision + recall + epsilon)
    f1 = jnp.clip(f1, epsilon, 1.0 - epsilon)
    return 1.0 - jnp.mean(f1)


def _f1_loss_ref(y_pred, y_true, classes=CLASSES, eps=EPSILON):
    y_oh = jax.nn.one_hot(y_true, classes, dtype=jnp.float32)
    p = jax.nn.softmax(y_pred.astype(jnp.float32), axis=1)
    tp = (y_oh * p).sum(0)
    fp = ((1 - y_oh) * p).sum(0)
    fn = (y_oh * (1 - p)).sum(0)
    prec = tp / (tp + fp + eps)
    rec = tp / (tp + fn + eps)
    f1 = 2 * prec * rec / (prec + rec + eps)
    return 1.0 - jnp.clip(f1, eps, 1 - eps).mean()


if __name__ == "__main__":
    key = jax.random.PRNGKey(0)
    k1, k2, k3, k4 = jax.random.split(key, 4)

    # small demo shape consistent with the module (batch=16, classes=9)
    N, C = 16, CLASSES
    y_pred = jax.random.normal(k1, (N, C), dtype=jnp.float32)
    y_true = jax.random.randint(k2, (N,), 0, C, dtype=jnp.int32)
    ref = _f1_loss_ref(y_pred, y_true)

    # structural correctness with exact reciprocal (tight tolerance)
    loss_exact = f1_loss(y_pred, y_true, approx_recip=False)
    jax.block_until_ready(loss_exact)
    assert jnp.allclose(loss_exact, ref, atol=1e-5), (loss_exact, ref)

    # default fast path (approx EUP reciprocal) -- looser tolerance
    loss = f1_loss(y_pred, y_true)
    jax.block_until_ready(loss)
    assert jnp.allclose(loss, ref, atol=2e-3), (loss, ref)

    # ragged batch (not a multiple of the tile): exercises in-kernel tail
    # masking, multi-tile accumulation and the 2-"core" split with a remainder
    N2 = 300
    y_pred2 = jax.random.normal(k3, (N2, C), dtype=jnp.float32)
    y_true2 = jax.random.randint(k4, (N2,), 0, C, dtype=jnp.int32)
    ref2 = _f1_loss_ref(y_pred2, y_true2)

    loss2 = f1_loss(y_pred2, y_true2, tile_n=128)   # 3 tiles -> 2 + 1(+dup) per core
    jax.block_until_ready(loss2)
    assert jnp.allclose(loss2, ref2, atol=2e-3), (loss2, ref2)

    loss3 = f1_loss(y_pred2, y_true2)               # default tile, clamp path
    jax.block_until_ready(loss3)
    assert jnp.allclose(loss3, ref2, atol=2e-3), (loss3, ref2)

    print("KERNEL_OK")
</pallas_src>

<mosaic_0001>
module attributes {stable_mosaic.version = 11 : i64} {
  func.func @_f1_partials_kernel(%arg0: i32, %arg1: i32, %arg2: memref<9x128xf32, #tpu.memory_space<vmem>>, %arg3: memref<1x128xi32, #tpu.memory_space<vmem>>, %arg4: memref<3x9x1xf32, #tpu.memory_space<vmem>>, %arg5: memref<9x1xf32, #tpu.memory_space<vmem>>, %arg6: memref<9x1xf32, #tpu.memory_space<vmem>>, %arg7: memref<9x1xf32, #tpu.memory_space<vmem>>) attributes {dimension_semantics = [#tpu.dimension_semantics<parallel>, #tpu.dimension_semantics<arbitrary>], iteration_bounds = array<i64: 2, 1>, scalar_prefetch = 0 : i64, scratch_operands = 3 : i64, tpu.core_type = #tpu.core_type<tc>, window_params = [{transform_indices = @transform_0, window_bounds = array<i64: 9, 128>}, {transform_indices = @transform_1, window_bounds = array<i64: 1, 128>}, {transform_indices = @transform_2, window_bounds = array<i64: 3, 9, 1>}]} {
    %c0_i32 = arith.constant 0 : i32
    %0 = arith.cmpi eq, %arg1, %c0_i32 : i32
    %1 = arith.extui %0 : i1 to i32
    %c0_i32_0 = arith.constant 0 : i32
    %2 = arith.cmpi ne, %1, %c0_i32_0 : i32
    scf.if %2 {
      %cst_27 = arith.constant 0.000000e+00 : f32
      %59 = vector.broadcast %cst_27 : f32 to vector<9x1xf32>
      %c0_28 = arith.constant 0 : index
      %c0_29 = arith.constant 0 : index
      %60 = vector.load %arg5[%c0_28, %c0_29] : memref<9x1xf32, #tpu.memory_space<vmem>>, vector<9x1xf32>
      tpu.vector_store %arg5[%c0_28, %c0_29], %59 {strides = array<i32>} : memref<9x1xf32, #tpu.memory_space<vmem>>, vector<9x1xf32>,
      %cst_30 = arith.constant 0.000000e+00 : f32
      %61 = vector.broadcast %cst_30 : f32 to vector<9x1xf32>
      %c0_31 = arith.constant 0 : index
      %c0_32 = arith.constant 0 : index
      %62 = vector.load %arg6[%c0_31, %c0_32] : memref<9x1xf32, #tpu.memory_space<vmem>>, vector<9x1xf32>
      tpu.vector_store %arg6[%c0_31, %c0_32], %61 {strides = array<i32>} : memref<9x1xf32, #tpu.memory_space<vmem>>, vector<9x1xf32>,
      %cst_33 = arith.constant 0.000000e+00 : f32
      %63 = vector.broadcast %cst_33 : f32 to vector<9x1xf32>
      %c0_34 = arith.constant 0 : index
      %c0_35 = arith.constant 0 : index
      %64 = vector.load %arg7[%c0_34, %c0_35] : memref<9x1xf32, #tpu.memory_space<vmem>>, vector<9x1xf32>
      tpu.vector_store %arg7[%c0_34, %c0_35], %63 {strides = array<i32>} : memref<9x1xf32, #tpu.memory_space<vmem>>, vector<9x1xf32>,
    } else {
    }
    %c1_i32 = arith.constant 1 : i32
    %3 = arith.muli %arg0, %c1_i32 : i32
    %4 = arith.addi %3, %arg1 : i32
    %c128_i32 = arith.constant 128 : i32
    %5 = arith.muli %4, %c128_i32 : i32
    %6 = tpu.iota {dimensions = array<i32: 1>} : vector<1x128xi32>
    %7 = vector.broadcast %5 : i32 to vector<1x128xi32>
    %8 = arith.addi %7, %6 : vector<1x128xi32>
    %c16_i32 = arith.constant 16 : i32
    %9 = vector.broadcast %c16_i32 : i32 to vector<1x128xi32>
    %10 = arith.cmpi slt, %8, %9 : vector<1x128xi32>
    %c0 = arith.constant 0 : index
    %c0_1 = arith.constant 0 : index
    %11 = vector.load %arg2[%c0, %c0_1] : memref<9x128xf32, #tpu.memory_space<vmem>>, vector<9x128xf32>
    %cst = arith.constant 0.000000e+00 : f32
    %12 = vector.shape_cast %10 : vector<1x128xi1> to vector<1x128xi1>
    %13 = vector.broadcast %12 : vector<1x128xi1> to vector<9x128xi1>
    %14 = vector.broadcast %cst : f32 to vector<9x128xf32>
    %15 = arith.select %13, %11, %14 : vector<9x128xi1>, vector<9x128xf32>
    %c0_2 = arith.constant 0 : index
    %c0_3 = arith.constant 0 : index
    %16 = vector.load %arg3[%c0_2, %c0_3] : memref<1x128xi32, #tpu.memory_space<vmem>>, vector<1x128xi32>
    %c-1_i32 = arith.constant -1 : i32
    %17 = vector.broadcast %c-1_i32 : i32 to vector<1x128xi32>
    %18 = arith.select %10, %16, %17 : vector<1x128xi1>, vector<1x128xi32>
    %cst_4 = arith.constant dense<0xFF800000> : vector<128xf32>
    %19 = vector.multi_reduction <maximumf>, %15, %cst_4 [0] : vector<9x128xf32> to vector<128xf32>
    %20 = vector.shape_cast %19 : vector<128xf32> to vector<1x128xf32>
    %21 = vector.broadcast %20 : vector<1x128xf32> to vector<9x128xf32>
    %22 = arith.subf %15, %21 : vector<9x128xf32>
    %23 = math.exp %22 : vector<9x128xf32>
    %cst_5 = arith.constant dense<0.000000e+00> : vector<128xf32>
    %24 = vector.multi_reduction <add>, %23, %cst_5 [0] : vector<9x128xf32> to vector<128xf32>
    %25 = vector.shape_cast %24 : vector<128xf32> to vector<1x128xf32>
    %26 = tpu.reciprocal %25 : vector<1x128xf32> -> vector<1x128xf32>
    %27 = vector.broadcast %26 : vector<1x128xf32> to vector<9x128xf32>
    %28 = arith.mulf %23, %27 : vector<9x128xf32>
    %29 = tpu.iota {dimensions = array<i32: 0>} : vector<9x128xi32>
    %30 = vector.broadcast %18 : vector<1x128xi32> to vector<9x128xi32>
    %31 = arith.cmpi eq, %29, %30 : vector<9x128xi32>
    %c0_6 = arith.constant 0 : index
    %c0_7 = arith.constant 0 : index
    %32 = vector.load %arg5[%c0_6, %c0_7] : memref<9x1xf32, #tpu.memory_space<vmem>>, vector<9x1xf32>
    %cst_8 = arith.constant 0.000000e+00 : f32
    %33 = vector.broadcast %cst_8 : f32 to vector<9x128xf32>
    %34 = arith.select %31, %28, %33 : vector<9x128xi1>, vector<9x128xf32>
    %cst_9 = arith.constant dense<0.000000e+00> : vector<9xf32>
    %35 = vector.multi_reduction <add>, %34, %cst_9 [1] : vector<9x128xf32> to vector<9xf32>
    %36 = vector.shape_cast %35 : vector<9xf32> to vector<9x1xf32>
    %37 = arith.addf %32, %36 : vector<9x1xf32>
    %c0_10 = arith.constant 0 : index
    %c0_11 = arith.constant 0 : index
    %38 = vector.load %arg5[%c0_10, %c0_11] : memref<9x1xf32, #tpu.memory_space<vmem>>, vector<9x1xf32>
    tpu.vector_store %arg5[%c0_10, %c0_11], %37 {strides = array<i32>} : memref<9x1xf32, #tpu.memory_space<vmem>>, vector<9x1xf32>,
    %c0_12 = arith.constant 0 : index
    %c0_13 = arith.constant 0 : index
    %39 = vector.load %arg6[%c0_12, %c0_13] : memref<9x1xf32, #tpu.memory_space<vmem>>, vector<9x1xf32>
    %cst_14 = arith.constant 0.000000e+00 : f32
    %40 = vector.shape_cast %10 : vector<1x128xi1> to vector<1x128xi1>
    %41 = vector.broadcast %40 : vector<1x128xi1> to vector<9x128xi1>
    %42 = vector.broadcast %cst_14 : f32 to vector<9x128xf32>
    %43 = arith.select %41, %28, %42 : vector<9x128xi1>, vector<9x128xf32>
    %cst_15 = arith.constant dense<0.000000e+00> : vector<9xf32>
    %44 = vector.multi_reduction <add>, %43, %cst_15 [1] : vector<9x128xf32> to vector<9xf32>
    %45 = vector.shape_cast %44 : vector<9xf32> to vector<9x1xf32>
    %46 = arith.addf %39, %45 : vector<9x1xf32>
    %c0_16 = arith.constant 0 : index
    %c0_17 = arith.constant 0 : index
    %47 = vector.load %arg6[%c0_16, %c0_17] : memref<9x1xf32, #tpu.memory_space<vmem>>, vector<9x1xf32>
    tpu.vector_store %arg6[%c0_16, %c0_17], %46 {strides = array<i32>} : memref<9x1xf32, #tpu.memory_space<vmem>>, vector<9x1xf32>,
    %c0_18 = arith.constant 0 : index
    %c0_19 = arith.constant 0 : index
    %48 = vector.load %arg7[%c0_18, %c0_19] : memref<9x1xf32, #tpu.memory_space<vmem>>, vector<9x1xf32>
    %cst_20 = arith.constant 1.000000e+00 : f32
    %cst_21 = arith.constant 0.000000e+00 : f32
    %49 = vector.broadcast %cst_20 : f32 to vector<9x128xf32>
    %50 = vector.broadcast %cst_21 : f32 to vector<9x128xf32>
    %51 = arith.select %31, %49, %50 : vector<9x128xi1>, vector<9x128xf32>
    %cst_22 = arith.constant dense<0.000000e+00> : vector<9xf32>
    %52 = vector.multi_reduction <add>, %51, %cst_22 [1] : vector<9x128xf32> to vector<9xf32>
    %53 = vector.shape_cast %52 : vector<9xf32> to vector<9x1xf32>
    %54 = arith.addf %48, %53 : vector<9x1xf32>
    %c0_23 = arith.constant 0 : index
    %c0_24 = arith.constant 0 : index
    %55 = vector.load %arg7[%c0_23, %c0_24] : memref<9x1xf32, #tpu.memory_space<vmem>>, vector<9x1xf32>
    tpu.vector_store %arg7[%c0_23, %c0_24], %54 {strides = array<i32>} : memref<9x1xf32, #tpu.memory_space<vmem>>, vector<9x1xf32>,
    %c0_i32_25 = arith.constant 0 : i32
    %56 = arith.cmpi eq, %arg1, %c0_i32_25 : i32
    %57 = arith.extui %56 : i1 to i32
    %c0_i32_26 = arith.constant 0 : i32
    %58 = arith.cmpi ne, %57, %c0_i32_26 : i32
    scf.if %58 {
      %c0_27 = arith.constant 0 : index
      %c0_28 = arith.constant 0 : index
      %59 = vector.load %arg5[%c0_27, %c0_28] : memref<9x1xf32, #tpu.memory_space<vmem>>, vector<9x1xf32>
      %c0_29 = arith.constant 0 : index
      %c0_30 = arith.constant 0 : index
      %c0_31 = arith.constant 0 : index
      %60 = vector.load %arg4[%c0_29, %c0_30, %c0_31] : memref<3x9x1xf32, #tpu.memory_space<vmem>>, vector<1x9x1xf32>
      %61 = vector.shape_cast %60 : vector<1x9x1xf32> to vector<9x1xf32>
      %62 = vector.shape_cast %59 : vector<9x1xf32> to vector<1x9x1xf32>
      tpu.vector_store %arg4[%c0_29, %c0_30, %c0_31], %62 {strides = array<i32>} : memref<3x9x1xf32, #tpu.memory_space<vmem>>, vector<1x9x1xf32>,
      %c0_32 = arith.constant 0 : index
      %c0_33 = arith.constant 0 : index
      %63 = vector.load %arg6[%c0_32, %c0_33] : memref<9x1xf32, #tpu.memory_space<vmem>>, vector<9x1xf32>
      %c1 = arith.constant 1 : index
      %c0_34 = arith.constant 0 : index
      %c0_35 = arith.constant 0 : index
      %64 = vector.load %arg4[%c1, %c0_34, %c0_35] : memref<3x9x1xf32, #tpu.memory_space<vmem>>, vector<1x9x1xf32>
      %65 = vector.shape_cast %64 : vector<1x9x1xf32> to vector<9x1xf32>
      %66 = vector.shape_cast %63 : vector<9x1xf32> to vector<1x9x1xf32>
      tpu.vector_store %arg4[%c1, %c0_34, %c0_35], %66 {strides = array<i32>} : memref<3x9x1xf32, #tpu.memory_space<vmem>>, vector<1x9x1xf32>,
      %c0_36 = arith.constant 0 : index
      %c0_37 = arith.constant 0 : index
      %67 = vector.load %arg7[%c0_36, %c0_37] : memref<9x1xf32, #tpu.memory_space<vmem>>, vector<9x1xf32>
      %c2 = arith.constant 2 : index
      %c0_38 = arith.constant 0 : index
      %c0_39 = arith.constant 0 : index
      %68 = vector.load %arg4[%c2, %c0_38, %c0_39] : memref<3x9x1xf32, #tpu.memory_space<vmem>>, vector<1x9x1xf32>
      %69 = vector.shape_cast %68 : vector<1x9x1xf32> to vector<9x1xf32>
      %70 = vector.shape_cast %67 : vector<9x1xf32> to vector<1x9x1xf32>
      tpu.vector_store %arg4[%c2, %c0_38, %c0_39], %70 {strides = array<i32>} : memref<3x9x1xf32, #tpu.memory_space<vmem>>, vector<1x9x1xf32>,
    } else {
    }
    return
  }
  func.func @transform_0(%arg0: i32, %arg1: i32) -> (i32, i32) {
    %c1_i32 = arith.constant 1 : i32
    %0 = arith.muli %arg0, %c1_i32 : i32
    %1 = arith.addi %0, %arg1 : i32
    %c0_i32 = arith.constant 0 : i32
    %2 = arith.minsi %1, %c0_i32 : i32
    %c0_i32_0 = arith.constant 0 : i32
    %c0_i32_1 = arith.constant 0 : i32
    return %c0_i32_0, %2 : i32, i32
  }
  func.func @transform_1(%arg0: i32, %arg1: i32) -> (i32, i32) {
    %c1_i32 = arith.constant 1 : i32
    %0 = arith.muli %arg0, %c1_i32 : i32
    %1 = arith.addi %0, %arg1 : i32
    %c0_i32 = arith.constant 0 : i32
    %2 = arith.minsi %1, %c0_i32 : i32
    %c0_i32_0 = arith.constant 0 : i32
    %c0_i32_1 = arith.constant 0 : i32
    return %c0_i32_0, %2 : i32, i32
  }
  func.func @transform_2(%arg0: i32, %arg1: i32) -> (i32, i32, i32) {
    %c0_i32 = arith.constant 0 : i32
    %c0_i32_0 = arith.constant 0 : i32
    %c0_i32_1 = arith.constant 0 : i32
    return %arg0, %c0_i32, %c0_i32_0 : i32, i32, i32
  }
}

</mosaic_0001>

<bundles_post_ra>
// kernel: tpu_custom_call.1
= control target key start
LH: loop header
LB: loop body
LE: loop exit
PB: predicated region body
PF: predicated region fallthrough
CT: control target
= control target key end

     0   :  { %7 = vsyncpa [#allocation6], 0  ;;  %s734_s0 = inlined_call_operand.hbm [shape: f32[9,16], index: 0, kind: input, shape index: {}]   ;;  %s735_s1 = inlined_call_operand.vmem [shape: s32[1,16], index: 1, kind: input, shape index: {}]   ;;  %s736_s2 = inlined_call_operand.vmem [shape: f32[6,9,1], index: 2, kind: output, shape index: {}]  }
   0x1   :  { %9 = vsyncpa [#allocation6 + $0x1], 0  ;;  %s613_s9 = smov 0   ;;  %s615_s10 = smov 0  }
   0x2   :  { %s617_s11 = smov 0   ;;  %s619_s12 = smov 0  }
   0x3   :  { %s621_s13 = smov 0  }
   0x4 LB: > { %s432_s14 = sadd.s32 4294967295, %s592_s13   ;;  %s27_s15 = sadd.s32 1, %s588_s12  ;;  %s592_s13 = sphi %s621_s13, %s15_s13   ;;  %s588_s12 = sphi %s619_s12, %s743_s12   ;;  %s584_s11 = sphi %s617_s11, %s742_s11   ;;  %s580_s10 = sphi %s615_s10, %s724_s10   ;;  %s576_s9 = sphi %s613_s9, %s741_s9  }
   0x5   : > { %p29_p0 = scmp.ge.s32.totalorder %s27_s15, 2  ;;  %p573_p1 = scmp.ne.s32.totalorder %s580_s10, 0 }
   0x6   : > { %p48_p2 = scmp.eq.s32.totalorder %s592_s13, 0  ;;  %p53_p3 = scmp.ne.s32.totalorder %s580_s10, %s576_s9 }
   0x7   : > { %s745_s15 = smov (%p29_p0, %s27_s15), 0  ;;  %p54_p4 = scmp.eq.s32.totalorder %s432_s14, 0 }
   0x8   : > { %p49_p5 = por %p573_p1, %p48_p2  ;;  %p459_p7 = scmp.lt.s32.totalorder %s592_s13, 2 }
   0x9   : > { %p643_p6 = por %p54_p4, %p53_p3  ;;  %s594_s17 = smov [#allocation5]  }
   0xa   : > { %s148_s18 = sshll.u32 %s594_s17, 4  ;;  %p648_p8 = pnand %p459_p7, %p49_p5  ;;  %s149_s18 = int_to_ptr.vmem [resolvable:$true] %s148_s18 }
   0xb   : > { %s738_s16 = scalar_select %p643_p6, 1, 0 }
   0xc   : > { %s517_s22 = scalar_lea.hbm %s734_s0, 256  ;;  %p519_p10 = pneg %p648_p8 }
   0xd   : > { %p518_p9 = scmp.ne.s32.totalorder %s734_s0, %s517_s22  ;;  %p524_p13 = scmp.lt.s32.totalorder %s517_s22, %s517_s22 }
   0xf   : > { %p520_p11 = pnand %p519_p10, %p518_p9 }
  0x11   : > { %p521_p12 = pneg %p520_p11 }
  0x13   : > { %p526_p0 = pnand %p524_p13, %p521_p12 }
  0x15   : > { %529 = shalt.err (!%p526_p0)
}
  0x16   : > { %s530_s25 = scalar_lea.vmem %s149_s18, 256  ;;  %s537_s26 = scalar_lea.vmem %s149_s18, 512 }
  0x17   : > { %p531_p1 = scmp.ne.s32.totalorder %s149_s18, %s530_s25  ;;  %p538_p4 = scmp.lt.s32.totalorder %s149_s18, %s149_s18 }
  0x18   : > { %p539_p5 = scmp.lt.s32.totalorder %s537_s26, %s530_s25 }
  0x19   : > { %p533_p2 = pnand %p531_p1, %p519_p10 }
  0x1a   : > { %p540_p7 = por %p539_p5, %p538_p4 }
  0x1b   : > { %p534_p3 = pneg %p533_p2 }
  0x1d   : > { %p541_p6 = pnand %p540_p7, %p534_p3 }
  0x1f   : > { %544 = shalt.err (!%p541_p6)
}
  0x20   : > { %s595_s27 = smov 128   ;;  %s596_s28 = smov 8  }
  0x21   : > { %458 = dma.hbm_to_vmem [thread:$0]  (!%p648_p8), %s734_s0, 256, %s149_s18, [#allocation6], %s595_s27, %s595_s27, %s596_s28  }
  0x22   : > { %p438_p9 = scmp.ge.s32.totalorder %s592_s13, 1  ;;  %p168_p11 = scmp.lt.s32.totalorder %s592_s13, 3 }
  0x24   : > { %p169_p10 = pnand %p438_p9, %p168_p11 }
  0x25   : > { %s174_s3 = sand.u32 (!%p169_p10), 1, %s580_s10   ;;  %p740_p6 = scmp.ne.s32.totalorder (!%p169_p10), %s738_s16, 0 }
  0x26   : > { %172 = sbr.rel (%p169_p10) target bundleno = 276 (0x114), region = 28  ;;  %s439_s4 = sshll.u32 (!%p169_p10), %s174_s3, 4 }
  0x27   : > { %s175_s5 = scalar_lea.sflag (!%p169_p10), [#allocation6], %s174_s3  ;;  %s178_s6 = scalar_lea.vmem (!%p169_p10), [#allocation5], %s439_s4 }
  0x2b   : > { %570 = dma.done.wait (%p740_p6), %s175_s5, 256  }
  0x2c   : > { %572 = vsyncadd (%p740_p6), %s175_s5, 4294967040  ;;  %s445_s7 = sshll.u32 %s584_s11, 7  ;;  %v239_v0 = vlaneseq  ;;  %vm229_vm0 = vcmask 7168   ;;  %v597_v2 = vmov 0.0   ;;  %vm252_vm2 = vcmask 1040384   ;;  %v244_v5 = vld [vmem:[%s178_s6] sm:$0xff] }
  0x2d   : > { %v241_v1 = vstv %s445_s7  ;;  %233 = vst.msk [vmem:[#allocation3] sm:$0xff] %vm229_vm0, %v597_v2  ;;  %230 = vst.msk [vmem:[#allocation2] sm:$0xff] %vm229_vm0, %v597_v2  ;;  %v245_v6 = vld [vmem:[%s178_s6 + $0x8] sm:$0x1]  ;;  %p210_p8 = scmp.lt.s32.totalorder %s584_s11, 0  ;;  %vm231_vm5 = vcmask 0  }
  0x2e   : > { %235 = vst.msk [vmem:[#allocation4] sm:$0xff] %vm229_vm0, %v597_v2  ;;  %v240_v3 = vand.u32 127, %v239_v0  ;;  %v279_v31 = vshrl.u32 %v239_v0, 7  ;;  %s218_s17 = smul.u32 3, %s584_s11 }
  0x2f   : > { %s211_s8 = scalar_select %p210_p8, %s584_s11, 0  ;;  %234 = vst.msk [vmem:[#allocation3 + $0x8] sm:$0x1] %vm231_vm5, %v597_v2  ;;  %232 = vst.msk [vmem:[#allocation2 + $0x8] sm:$0x1] %vm231_vm5, %v597_v2 }
  0x30   : > { %v242_v4 = vadd.s32 %v241_v1, %v240_v3  ;;  %v283_v33 = vsub.s32 0, %v279_v31  ;;  %v280_v36 = vadd.s32 8, %v279_v31  ;;  %236 = vst.msk [vmem:[#allocation4 + $0x8] sm:$0x1] %vm231_vm5, %v597_v2  ;;  %p219_p12 = scmp.lt.s32.totalorder %s218_s17, 5 }
  0x31   : > { %s747_s8 = smov (!%p210_p8, %s211_s8), 0 }
  0x32   : > { %vm243_vm1 = vcmp.lt.s32.totalorder %v242_v4, 16  ;;  %s214_s16 = scalar_lea.vmem %s735_s1, %s747_s8  ;;  %s749_s17 = smov (!%p219_p12, %s218_s17), 5 }
  0x33   : > { %v248_v7 = vsel %vm243_vm1, %v244_v5, 0.0  ;;  %v249_v8 = vsel %vm243_vm1, %v245_v6, 0.0  ;;  %v250_v32 = vld [vmem:[%s214_s16] sm:$0x1]  ;;  %s452_s18 = sshll.u32 %s749_s17, 4 }
  0x34   : > { %v253_v9 = vsel %vm252_vm2, %v249_v8, -inf  ;;  %v251_v34 = vsel %vm243_vm1, %v250_v32, 4294967295  ;;  %v302_v49 = vld [vmem:[#allocation3] sm:$0xff]  ;;  %v287_v50 = vld [vmem:[#allocation2] sm:$0xff]  ;;  %s223_s20 = scalar_lea.vmem %s736_s2, %s452_s18 }
  0x35   : > { %v254_v10 = vmax.f32 %v248_v7, %v253_v9  ;;  %v284_v35 = vrot.slane %v251_v34, %v283_v33  ;;  %v315_v62 = vld [vmem:[#allocation4] sm:$0xff] }
  0x36   : > { %v303_v55 = vld [vmem:[#allocation3 + $0x8] sm:$0x1]  ;;  %v288_v56 = vld [vmem:[#allocation2 + $0x8] sm:$0x1] }
  0x37   : > { %v255_v11 = vrot.slane %v254_v10, 4  ;;  %vm285_vm3 = vcmp.eq.s32.totalorder %v279_v31, %v284_v35  ;;  %vm286_vm4 = vcmp.eq.s32.totalorder %v280_v36, %v284_v35  ;;  %v316_v61 = vld [vmem:[#allocation4 + $0x8] sm:$0x1] }
  0x38   : > { %v318_v46 = vsel %vm286_vm4, 1.0, %v597_v2  ;;  %v317_v48 = vsel %vm285_vm3, 1.0, %v597_v2 }
  0x39   : > { %v256_v12 = vmax.f32 %v254_v10, %v255_v11  ;;  %v321_v47 = vsel %vm252_vm2, %v318_v46, 0.0 }
  0x3b   : > { %v257_v13 = vrot.slane %v256_v12, 2 }
  0x3d   : > { %v258_v14 = vmax.f32 %v256_v12, %v257_v13 }
  0x3f   : > { %v259_v15 = vrot.slane %v258_v14, 1 }
  0x41   : > { %v260_v16 = vmax.f32 %v258_v14, %v259_v15 }
  0x43   : > { %v261_v17 = vsub.f32 %v248_v7, %v260_v16  ;;  %v262_v18 = vsub.f32 %v249_v8, %v260_v16 }
  0x45   : > { %v263_v19 = vmul.f32 1.442695, %v261_v17  ;;  %v265_v20 = vmul.f32 1.442695, %v262_v18 }
  0x47   : > { %511 = vpow2.f32 %v263_v19 }
  0x48   : > { %513 = vpow2.f32 %v265_v20 }
  0x54   : > { %v512_v21 = vpop.eup %511 }
  0x55   : > { %v514_v22 = vpop.eup %513 }
  0x56   : > { %v267_v23 = vsel %vm252_vm2, %v514_v22, 0.0 }
  0x57   : > { %v268_v24 = vadd.f32 %v512_v21, %v267_v23 }
  0x59   : > { %v269_v25 = vrot.slane %v268_v24, 4 }
  0x5b   : > { %v270_v26 = vadd.f32 %v269_v25, %v268_v24 }
  0x5d   : > { %v271_v27 = vrot.slane %v270_v26, 2 }
  0x5f   : > { %v272_v28 = vadd.f32 %v271_v27, %v270_v26 }
  0x61   : > { %v273_v29 = vrot.slane %v272_v28, 1 }
  0x63   : > { %v274_v30 = vadd.f32 %v273_v29, %v272_v28 }
  0x65   : > { %515 = vrcp.f32 %v274_v30 }
  0x72   : > { %v516_v37 = vpop.eup %515 }
  0x73   : > { %v276_v38 = vmul.f32 %v516_v37, %v512_v21  ;;  %v277_v39 = vmul.f32 %v516_v37, %v514_v22 }
  0x75   : > { %v304_v40 = vsel %vm243_vm1, %v276_v38, 0.0  ;;  %v289_v41 = vsel %vm285_vm3, %v276_v38, 0.0  ;;  %v305_v42 = vsel %vm243_vm1, %v277_v39, 0.0  ;;  %v290_v43 = vsel %vm286_vm4, %v277_v39, 0.0 }
  0x76   : > { %306 = vadd.xlane.f32.xlu1 %v304_v40  ;;  %291 = vadd.xlane.f32.xlu0 %v289_v41  ;;  %v308_v44 = vsel %vm252_vm2, %v305_v42, 0.0  ;;  %v293_v45 = vsel %vm252_vm2, %v290_v43, 0.0 }
  0x7a   : > { %309 = vadd.xlane.f32.xlu1 %v308_v44  ;;  %294 = vadd.xlane.f32.xlu0 %v293_v45 }
  0x7e   : > { %322 = vadd.xlane.f32.xlu1 %v321_v47  ;;  %319 = vadd.xlane.f32.xlu0 %v317_v48 }
  0xff   : > { %v307_v51 = vpop.xlane.xlu1 %306  ;;  %v292_v52 = vpop.xlane.xlu0 %291 }
 0x100   : > { %v311_v53 = vadd.f32 %v307_v51, %v302_v49  ;;  %v296_v54 = vadd.f32 %v292_v52, %v287_v50 }
 0x102   : > { %313 = vst.msk [vmem:[#allocation3] sm:$0xff] %vm229_vm0, %v311_v53  ;;  %299 = vst.msk [vmem:[#allocation2] sm:$0xff] %vm229_vm0, %v296_v54 }
 0x103   : > { %v310_v57 = vpop.xlane.xlu1 %309  ;;  %v295_v58 = vpop.xlane.xlu0 %294 }
 0x104   : > { %v312_v59 = vadd.f32 %v310_v57, %v303_v55  ;;  %v297_v60 = vadd.f32 %v295_v58, %v288_v56 }
 0x106   : > { %314 = vst.msk [vmem:[#allocation3 + $0x8] sm:$0x1] %vm231_vm5, %v312_v59  ;;  %301 = vst.msk [vmem:[#allocation2 + $0x8] sm:$0x1] %vm231_vm5, %v297_v60 }
 0x107   : > { %v323_v63 = vpop.xlane.xlu1 %322  ;;  %v320_v0 = vpop.xlane.xlu0 %319 }
 0x108   : > { %v325_v1 = vadd.f32 %v323_v63, %v316_v61  ;;  %v324_v2 = vadd.f32 %v320_v0, %v315_v62 }
 0x109   : > { %v335_v3 = vld [vmem:[#allocation3] sm:$0xff]  ;;  %v331_v4 = vld [vmem:[#allocation2] sm:$0xff] }
 0x10a   : > { %333 = vst.msk [vmem:[%s223_s20] sm:$0xff] %vm229_vm0, %v331_v4  ;;  %326 = vst.msk [vmem:[#allocation4] sm:$0xff] %vm229_vm0, %v324_v2 }
 0x10b   : > { %327 = vst.msk [vmem:[#allocation4 + $0x8] sm:$0x1] %vm231_vm5, %v325_v1 }
 0x10c   : > { %446 = vst.msk [vmem:[%s223_s20 + $0x10] sm:$0xff] %vm229_vm0, %v335_v3 }
 0x10d   : > { %v336_v5 = vld [vmem:[#allocation3 + $0x8] sm:$0x1]  ;;  %v332_v6 = vld [vmem:[#allocation2 + $0x8] sm:$0x1] }
 0x10e   : > { %334 = vst.msk [vmem:[%s223_s20 + $0x8] sm:$0x1] %vm231_vm5, %v332_v6  ;;  %447 = vst.msk [vmem:[%s223_s20 + $0x18] sm:$0x1] %vm231_vm5, %v336_v5 }
 0x111   : > { %v340_v8 = vld [vmem:[#allocation4] sm:$0xff] }
 0x112   : > { %v341_v7 = vld [vmem:[#allocation4 + $0x8] sm:$0x1]  ;;  %448 = vst.msk [vmem:[%s223_s20 + $0x20] sm:$0xff] %vm229_vm0, %v340_v8 }
 0x113   : > { %449 = vst.msk [vmem:[%s223_s20 + $0x28] sm:$0x1] %vm231_vm5, %v341_v7 }
 0x114 PF: > { %s15_s13 = sadd.s32 1, %s592_s13   ;;  %s741_s9 = smov %s580_s10 }
 0x115   : > { %p12_p13 = scmp.ge.s32.totalorder %s15_s13, 4   ;;  %s724_s10 = smov 0  }
 0x116   : > { %s742_s11 = smov %s588_s12  ;;  %s743_s12 = smov %s745_s15 }
 0x117   :  { %14 = sbr.rel (!%p12_p13) target bundleno = 4 (0x4), region = 81 }
 0x11c   :  { %369 = vsyncpa [#allocation6], 1 }
 0x11d   :  { %371 = vsyncpa [#allocation6 + $0x1], 1 }

</bundles_post_ra>
